<compile_context>
chip_gen: v5e
topology: v5e:2x2
jax: 0.10.0
libtpu: 0.0.40
codegen_flags: <defaults>
</compile_context>

<pallas_src>
import jax
import jax.numpy as jnp
from jax.experimental import pallas as pl
from jax.experimental.pallas import tpu as pltpu

BOARD_SIZE = 3
D_IN = BOARD_SIZE * BOARD_SIZE          # 9 (flattened board)
N_QUBITS = 7
D_QNN = 2 ** N_QUBITS                   # 128 sampler outcomes (= lane width)
D_OUT = 9
X_PAD = 16                              # padded input lanes (9 data + 1 bias + 6 zero)
LANE = 128                              # lane-dense middle / output width
MAX_TILE_B = 512                        # cap on batch rows per grid step


def qcnn_kernel(x_ref, wf_ref, w2_ref, b2_ref, o_ref):
    # x_ref : (TILE_B, 16) bf16  lanes 0:9 board, lane 9 = 1.0 (bias), rest 0
    # wf_ref: (16, 128)    bf16  rows 0:9 = w1@wq, row 9 = b1@wq + bq, rest 0
    # w2_ref: (128, 128)   bf16  cols 0:9 = Linear(128 -> 9) weight, rest 0
    # b2_ref: (1, 128)     f32   lanes 0:9 = Linear(128 -> 9) bias, rest 0
    # o_ref : (TILE_B, 128) f32  lanes 0:9 hold the result; padding is tanh(0)=0
    x = x_ref[...]

    # Fused Linear(9->7) + surrogate-QNN linear(7->128), bias folded into row 9.
    z = jnp.dot(x, wf_ref[...], preferred_element_type=jnp.float32)

    # Softmax over the 128 outcomes -> quasi-probability distribution (f32 math).
    z = z - jnp.max(z, axis=-1, keepdims=True)                 # XLU lane reduce
    e = jnp.exp(z)                                             # EUP
    inv = pl.reciprocal(jnp.sum(e, axis=-1, keepdims=True), approx=True)
    p = e * inv

    # nn.Linear(128, 9) + nn.Tanh (lanes 9:128 of y are exactly 0 -> tanh(0)=0).
    y = jnp.dot(p.astype(jnp.bfloat16), w2_ref[...],
                preferred_element_type=jnp.float32) + b2_ref[...]
    o_ref[...] = jnp.tanh(y).astype(o_ref.dtype)


def make_params(key):
    """Raw (unpadded) weights, mimicking torch nn.Linear default init."""
    k1, k2, k3, k4, k5, k6 = jax.random.split(key, 6)

    def uniform(k, shape, fan_in):
        lim = 1.0 / jnp.sqrt(float(fan_in))
        return jax.random.uniform(k, shape, jnp.float32, -lim, lim)

    return {
        "w1": uniform(k1, (D_IN, N_QUBITS), D_IN),
        "b1": uniform(k2, (N_QUBITS,), D_IN),
        "wq": uniform(k3, (N_QUBITS, D_QNN), N_QUBITS),   # surrogate QNN map
        "bq": uniform(k4, (D_QNN,), N_QUBITS),
        "w2": uniform(k5, (D_QNN, D_OUT), D_QNN),
        "b2": uniform(k6, (D_QNN,), D_QNN)[:D_OUT],
    }


def pad_params(params):
    """One-time fusion + padding into lane-dense bf16 tiles (out of hot path)."""
    # Fuse the two back-to-back linear layers (exact transformation in f32).
    wf = params["w1"] @ params["wq"]                       # (9, 128)
    bf = params["b1"] @ params["wq"] + params["bq"]        # (128,)

    wf_p = jnp.zeros((X_PAD, D_QNN), jnp.float32)
    wf_p = wf_p.at[:D_IN, :].set(wf)
    wf_p = wf_p.at[D_IN, :].set(bf)                        # bias row (hit by x lane 9)

    w2_p = jnp.zeros((D_QNN, LANE), jnp.float32)
    w2_p = w2_p.at[:, :D_OUT].set(params["w2"])

    b2_p = jnp.zeros((1, LANE), jnp.float32)
    b2_p = b2_p.at[0, :D_OUT].set(params["b2"])

    return {
        "wf": wf_p.astype(jnp.bfloat16),
        "w2": w2_p.astype(jnp.bfloat16),
        "b2": b2_p,                                        # keep bias add in f32
    }


def _choose_tile_b(B):
    """Largest tile <= MAX_TILE_B that still yields >= 2 grid steps (v7x: 2 TCs)."""
    half = -(-B // 2)                  # ceil(B / 2)
    half = -(-half // 16) * 16         # round up to multiple of 16 (bf16 sublanes)
    return max(16, min(MAX_TILE_B, half))


@jax.jit
def qcnn_forward(state, padded):
    """state: (B, 9) flattened boards -> (B, 9) tanh outputs."""
    B = state.shape[0]
    tile_b = _choose_tile_b(B)
    n_tiles = (B + tile_b - 1) // tile_b
    b_pad = n_tiles * tile_b

    # Small (B_pad, 16) bf16 slab: board in lanes 0:9, 1.0 in lane 9 (bias fold).
    xp = jnp.zeros((b_pad, X_PAD), jnp.bfloat16)
    xp = xp.at[:B, :D_IN].set(state.astype(jnp.bfloat16))
    xp = xp.at[:, D_IN].set(jnp.bfloat16(1.0))

    cost = pl.CostEstimate(
        flops=2 * b_pad * (X_PAD * D_QNN + D_QNN * LANE),   # two fused matmuls
        transcendentals=2 * b_pad * D_QNN,                  # exp + tanh
        bytes_accessed=(2 * b_pad * X_PAD                   # x (bf16)
                        + 2 * (X_PAD * D_QNN + D_QNN * LANE)  # bf16 weights
                        + 4 * LANE                          # b2 (f32)
                        + 4 * b_pad * LANE),                # f32 output
    )

    out = pl.pallas_call(
        qcnn_kernel,
        out_shape=jax.ShapeDtypeStruct((b_pad, LANE), jnp.float32),
        grid=(n_tiles,),
        in_specs=[
            pl.BlockSpec((tile_b, X_PAD), lambda i: (i, 0)),   # x (per batch tile)
            pl.BlockSpec((X_PAD, D_QNN), lambda i: (0, 0)),    # fused W (resident)
            pl.BlockSpec((D_QNN, LANE), lambda i: (0, 0)),     # w2 (resident)
            pl.BlockSpec((1, LANE), lambda i: (0, 0)),         # b2 (resident)
        ],
        out_specs=pl.BlockSpec((tile_b, LANE), lambda i: (i, 0)),
        compiler_params=pltpu.CompilerParams(
            dimension_semantics=("parallel",)),                # v7x: 2 TCs split batch
        cost_estimate=cost,
    )(xp, padded["wf"], padded["w2"], padded["b2"])

    return out[:B, :D_OUT]


def qcnn_reference(state, params):
    """Pure-JAX f32 reference of the same (surrogate) forward pass."""
    h = state @ params["w1"] + params["b1"]
    p = jax.nn.softmax(h @ params["wq"] + params["bq"], axis=-1)
    return jnp.tanh(p @ params["w2"] + params["b2"])


if __name__ == "__main__":
    key = jax.random.PRNGKey(0)
    k_params, k_state = jax.random.split(key)

    B = 256                                           # batch of 3x3 boards
    params = make_params(k_params)
    padded = pad_params(params)                       # hoisted: fuse + pad once

    state = jax.random.normal(k_state, (B, D_IN), jnp.float32)

    out = qcnn_forward(state, padded)
    jax.block_until_ready(out)

    ref = qcnn_reference(state, params)

    assert out.shape == (B, D_OUT)
    assert bool(jnp.all(jnp.isfinite(out)))
    assert bool(jnp.all(jnp.abs(out) <= 1.0))         # tanh range
    assert bool(jnp.allclose(out, ref, atol=2e-2, rtol=2e-2))
    print("KERNEL_OK")
</pallas_src>

<mosaic_0001>
module attributes {stable_mosaic.version = 11 : i64} {
  func.func @qcnn_kernel(%arg0: i32, %arg1: memref<128x16xbf16, #tpu.memory_space<vmem>>, %arg2: memref<16x128xbf16, #tpu.memory_space<vmem>>, %arg3: memref<128x128xbf16, #tpu.memory_space<vmem>>, %arg4: memref<1x128xf32, #tpu.memory_space<vmem>>, %arg5: memref<128x128xf32, #tpu.memory_space<vmem>>) attributes {dimension_semantics = [#tpu.dimension_semantics<parallel>], iteration_bounds = array<i64: 2>, scalar_prefetch = 0 : i64, scratch_operands = 0 : i64, tpu.core_type = #tpu.core_type<tc>, window_params = [{transform_indices = @transform_0, window_bounds = array<i64: 128, 16>}, {pipeline_mode = #tpu.pipeline_mode<synchronous>, transform_indices = @transform_1, window_bounds = array<i64: 16, 128>}, {pipeline_mode = #tpu.pipeline_mode<synchronous>, transform_indices = @transform_2, window_bounds = array<i64: 128, 128>}, {pipeline_mode = #tpu.pipeline_mode<synchronous>, transform_indices = @transform_3, window_bounds = array<i64: 1, 128>}, {transform_indices = @transform_4, window_bounds = array<i64: 128, 128>}]} {
    %c0 = arith.constant 0 : index
    %c0_0 = arith.constant 0 : index
    %0 = vector.load %arg1[%c0, %c0_0] : memref<128x16xbf16, #tpu.memory_space<vmem>>, vector<128x16xbf16>
    %c0_1 = arith.constant 0 : index
    %c0_2 = arith.constant 0 : index
    %1 = vector.load %arg2[%c0_1, %c0_2] : memref<16x128xbf16, #tpu.memory_space<vmem>>, vector<16x128xbf16>
    %cst = arith.constant dense<0.000000e+00> : vector<128x128xf32>
    %2 = tpu.matmul %0, %1, %cst {dimension_numbers = #tpu.dot_dimension_numbers<[1], [0], [0], [1], [0, 0, 1, 1], [], []>} : vector<128x16xbf16>, vector<16x128xbf16>, vector<128x128xf32> -> vector<128x128xf32>
    %cst_3 = arith.constant dense<0xFF800000> : vector<128xf32>
    %3 = vector.multi_reduction <maximumf>, %2, %cst_3 [1] : vector<128x128xf32> to vector<128xf32>
    %4 = vector.shape_cast %3 : vector<128xf32> to vector<128x1xf32>
    %5 = vector.broadcast %4 : vector<128x1xf32> to vector<128x128xf32>
    %6 = arith.subf %2, %5 : vector<128x128xf32>
    %7 = math.exp %6 : vector<128x128xf32>
    %cst_4 = arith.constant dense<0.000000e+00> : vector<128xf32>
    %8 = vector.multi_reduction <add>, %7, %cst_4 [1] : vector<128x128xf32> to vector<128xf32>
    %9 = vector.shape_cast %8 : vector<128xf32> to vector<128x1xf32>
    %10 = tpu.reciprocal %9 {approx = true} : vector<128x1xf32> -> vector<128x1xf32>
    %11 = vector.broadcast %10 : vector<128x1xf32> to vector<128x128xf32>
    %12 = arith.mulf %7, %11 : vector<128x128xf32>
    %13 = arith.truncf %12 : vector<128x128xf32> to vector<128x128xbf16>
    %c0_5 = arith.constant 0 : index
    %c0_6 = arith.constant 0 : index
    %14 = vector.load %arg3[%c0_5, %c0_6] : memref<128x128xbf16, #tpu.memory_space<vmem>>, vector<128x128xbf16>
    %cst_7 = arith.constant dense<0.000000e+00> : vector<128x128xf32>
    %15 = tpu.matmul %13, %14, %cst_7 {dimension_numbers = #tpu.dot_dimension_numbers<[1], [0], [0], [1], [0, 0, 1, 1], [], []>} : vector<128x128xbf16>, vector<128x128xbf16>, vector<128x128xf32> -> vector<128x128xf32>
    %c0_8 = arith.constant 0 : index
    %c0_9 = arith.constant 0 : index
    %16 = vector.load %arg4[%c0_8, %c0_9] : memref<1x128xf32, #tpu.memory_space<vmem>>, vector<1x128xf32>
    %17 = vector.broadcast %16 : vector<1x128xf32> to vector<128x128xf32>
    %18 = arith.addf %15, %17 : vector<128x128xf32>
    %19 = math.tanh %18 : vector<128x128xf32>
    %c0_10 = arith.constant 0 : index
    %c0_11 = arith.constant 0 : index
    %20 = vector.load %arg5[%c0_10, %c0_11] : memref<128x128xf32, #tpu.memory_space<vmem>>, vector<128x128xf32>
    tpu.vector_store %arg5[%c0_10, %c0_11], %19 {strides = array<i32>} : memref<128x128xf32, #tpu.memory_space<vmem>>, vector<128x128xf32>,
    return
  }
  func.func @transform_0(%arg0: i32) -> (i32, i32) {
    %c0_i32 = arith.constant 0 : i32
    %c0_i32_0 = arith.constant 0 : i32
    return %arg0, %c0_i32 : i32, i32
  }
  func.func @transform_1(%arg0: i32) -> (i32, i32) {
    %c0_i32 = arith.constant 0 : i32
    %c0_i32_0 = arith.constant 0 : i32
    %c0_i32_1 = arith.constant 0 : i32
    return %c0_i32, %c0_i32_0 : i32, i32
  }
  func.func @transform_2(%arg0: i32) -> (i32, i32) {
    %c0_i32 = arith.constant 0 : i32
    %c0_i32_0 = arith.constant 0 : i32
    %c0_i32_1 = arith.constant 0 : i32
    return %c0_i32, %c0_i32_0 : i32, i32
  }
  func.func @transform_3(%arg0: i32) -> (i32, i32) {
    %c0_i32 = arith.constant 0 : i32
    %c0_i32_0 = arith.constant 0 : i32
    %c0_i32_1 = arith.constant 0 : i32
    return %c0_i32, %c0_i32_0 : i32, i32
  }
  func.func @transform_4(%arg0: i32) -> (i32, i32) {
    %c0_i32 = arith.constant 0 : i32
    %c0_i32_0 = arith.constant 0 : i32
    return %arg0, %c0_i32 : i32, i32
  }
}

</mosaic_0001>

<bundles_post_ra>
// kernel: qcnn_forward.1
= control target key start
LH: loop header
LB: loop body
LE: loop exit
PB: predicated region body
PF: predicated region fallthrough
CT: control target
= control target key end

     0   :  { %s948_s15 = smov 0   ;;  %s1139_s0 = inlined_call_operand.vmem [shape: bf16[256,16], index: 0, kind: input, shape index: {}]   ;;  %s1140_s1 = inlined_call_operand.vmem [shape: bf16[16,128], index: 1, kind: input, shape index: {}]   ;;  %s1141_s2 = inlined_call_operand.vmem [shape: bf16[128,128], index: 2, kind: input, shape index: {}]   ;;  %s1142_s3 = inlined_call_operand.vmem [shape: f32[1,128], index: 3, kind: input, shape index: {}]   ;;  %s1143_s4 = inlined_call_operand.vmem [shape: f32[256,128], index: 4, kind: output, shape index: {}]  }
   0x1 LB: > { %s697_s16 = sadd.s32 4294967295, %s921_s15   ;;  %p701_p0 = scmp.ge.s32.totalorder %s921_s15, 1  ;;  %s921_s15 = sphi %s948_s15, %s14_s15  }
   0x2   : > { %p163_p1 = scmp.lt.s32.totalorder %s921_s15, 3 }
   0x4   : > { %p164_p2 = pnand %p701_p0, %p163_p1 }
   0x5   : > { %s702_s19 = sshll.u32 (!%p164_p2), %s697_s16, 4 }
   0x6   : > { %167 = sbr.rel (%p164_p2) target bundleno = 738 (0x2e2), region = 36  ;;  %p190_p3 = scmp.lt.s32.totalorder (!%p164_p2), %s702_s19, 31 }
   0xb   : > { %v792_v0 = vld [vmem:[%s1140_s1] sm:$0xff]  ;;  %s1145_s19 = smov (!%p190_p3, %s702_s19), 31  ;;  %vm266_vm0 = vcmask 130048  }
   0xc   : > { %298 = vmatpush.bf16.msra.mxu0 %v792_v0  ;;  %801 = vmatpush.bf16.msra.mxu3 %v792_v0  ;;  %s703_s20 = sshll.u32 %s1145_s19, 2  ;;  %s705_s17 = sshll.u32 %s1145_s19, 3 }
   0xd   : > { %s193_s23 = scalar_lea.vmem %s1139_s0, %s703_s20  ;;  %s1104_s21 = scalar_lea.vmem %s1143_s4, %s705_s17 }
   0xe   : > { %v784_v1 = vld [vmem:[%s193_s23] sm:$0xff]  ;;  %v789_v2 = vld [vmem:[%s193_s23 + $0x28] sm:$0xff]  ;;  %v790_v4 = vld [vmem:[%s193_s23 + $0x30] sm:$0xff] }
   0xf   : > { %742 = vmatmul.msk.bf16.vlgmr.msra.gmra.mxu0 %vm266_vm0, %v784_v1  ;;  %747 = vmatmul.msk.bf16.vlgmr.msra.gmra.mxu3 %vm266_vm0, %v789_v2  ;;  %v785_v3 = vld [vmem:[%s193_s23 + $0x8] sm:$0xff]  ;;  %v786_v5 = vld [vmem:[%s193_s23 + $0x10] sm:$0xff]  ;;  %v791_v6 = vld [vmem:[%s193_s23 + $0x38] sm:$0xff] }
  0x10   : > { %v787_v7 = vld [vmem:[%s193_s23 + $0x18] sm:$0xff]  ;;  %v788_v8 = vld [vmem:[%s193_s23 + $0x20] sm:$0xff] }
  0x1f   : > { %743 = vmatmul.msk.bf16.gmra.mxu0 %vm266_vm0, %v785_v3  ;;  %748 = vmatmul.msk.bf16.gmra.mxu3 %vm266_vm0, %v790_v4 }
  0x2f   : > { %744 = vmatmul.msk.bf16.gmra.mxu0 %vm266_vm0, %v786_v5  ;;  %749 = vmatmul.msk.bf16.gmra.mxu3 %vm266_vm0, %v791_v6 }
  0x3f   : > { %745 = vmatmul.msk.bf16.gmra.mxu0 %vm266_vm0, %v787_v7 }
  0x4f   : > { %746 = vmatmul.msk.bf16.gmra.mxu0 %vm266_vm0, %v788_v8 }
  0x8c   : > { %v300_v9 = vpop.f32.mrf.mxu0 }
  0x8d   : > { %340 = vmax.xlane.f32.xlu1 %v300_v9 }
  0x92   : > { %v325_v10 = vpop.f32.mrf.mxu3 }
  0x93   : > { %360 = vmax.xlane.f32.xlu2 %v325_v10 }
  0x94   : > { %v302_v11 = vpop.f32.mrf.mxu0 }
  0x95   : > { %342 = vmax.xlane.f32.xlu1 %v302_v11 }
  0x9a   : > { %v327_v12 = vpop.f32.mrf.mxu3 }
  0x9b   : > { %362 = vmax.xlane.f32.xlu2 %v327_v12 }
  0x9c   : > { %v305_v13 = vpop.f32.mrf.mxu0 }
  0xa2   : > { %v973_v14 = vpop.f32.mrf.mxu3 }
  0xa3   : > { %364 = vmax.xlane.f32.xlu2 %v973_v14 }
  0xa4   : > { %v307_v15 = vpop.f32.mrf.mxu0 }
  0xa5   : > { %346 = vmax.xlane.f32.xlu1 %v307_v15 }
  0xaa   : > { %v976_v16 = vpop.f32.mrf.mxu3 }
  0xac   : > { %v978_v17 = vpop.f32.mrf.mxu0 }
  0xad   : > { %348 = vmax.xlane.f32.xlu1 %v978_v17 }
  0xb2   : > { %v981_v18 = vpop.f32.mrf.mxu3 }
  0xb4   : > { %v983_v19 = vpop.f32.mrf.mxu0 }
  0xb5   : > { %350 = vmax.xlane.f32.xlu2 %v983_v19 }
  0xba   : > { %v986_v20 = vpop.f32.mrf.mxu3 }
  0xbb   : > { %370 = vmax.xlane.f32.xlu1 %v986_v20 }
  0xbc   : > { %v989_v21 = vpop.f32.mrf.mxu0 }
  0xc3   : > { %352 = vmax.xlane.f32.xlu1 %v989_v21 }
  0xc4   : > { %v992_v22 = vpop.f32.mrf.mxu0 }
  0xcc   : > { %v320_v23 = vpop.f32.mrf.mxu0 }
  0xcd   : > { %356 = vmax.xlane.f32.xlu0 %v320_v23 }
  0xd4   : > { %v322_v24 = vpop.f32.mrf.mxu0 }
  0xd5   : > { %358 = vmax.xlane.f32.xlu0 %v322_v24 }
  0xdd   : > { %344 = vmax.xlane.f32.xlu0 %v305_v13 }
  0xe5   : > { %366 = vmax.xlane.f32.xlu0 %v976_v16 }
  0xed   : > { %368 = vmax.xlane.f32.xlu0 %v981_v18 }
 0x100   : > { %v341_v25 = vpop.xlane.xlu1 %340 }
 0x101   : > { %v372_v37 = vsub.f32 %v300_v9, %v341_v25  ;;  %v797_v25 = vld [vmem:[%s1141_s2 + $0x20] sm:$0xff] }
 0x103   : > { %v388_v42 = vmul.f32 1.442695, %v372_v37 }
 0x106   : > { %v361_v32 = vpop.xlane.xlu2 %360 }
 0x107   : > { %v382_v39 = vsub.f32 %v325_v10, %v361_v32 }
 0x108   : > { %v343_v26 = vpop.xlane.xlu1 %342 }
 0x109   : > { %v373_v27 = vsub.f32 %v302_v11, %v343_v26  ;;  %v408_v43 = vmul.f32 1.442695, %v382_v39  ;;  %v800_v11 = vld [vmem:[%s1141_s2 + $0x38] sm:$0xff] }
 0x10a   : > { %802 = vmatpush.bf16.msra.mxu2 %v800_v11  ;;  %560 = vmatpush.bf16.msra.mxu1 %v800_v11  ;;  %v796_v26 = vld [vmem:[%s1141_s2 + $0x18] sm:$0xff] }
 0x10b   : > { %v390_v28 = vmul.f32 1.442695, %v373_v27  ;;  %v795_v27 = vld [vmem:[%s1141_s2 + $0x10] sm:$0xff] }
 0x10d   : > { %819 = vpow2.f32 %v390_v28  ;;  %v794_v28 = vld [vmem:[%s1141_s2 + $0x8] sm:$0xff] }
 0x10e   : > { %v363_v40 = vpop.xlane.xlu2 %362 }
 0x10f   : > { %v383_v47 = vsub.f32 %v327_v12, %v363_v40 }
 0x111   : > { %v410_v50 = vmul.f32 1.442695, %v383_v47 }
 0x113   : > { %v996_v29 = vpop.eup %819 }
 0x114   : > { %422 = vadd.xlane.f32.xlu1 %v996_v29 }
 0x116   : > { %v365_v51 = vpop.xlane.xlu2 %364 }
 0x117   : > { %v384_v59 = vsub.f32 %v973_v14, %v365_v51 }
 0x118   : > { %v347_v41 = vpop.xlane.xlu1 %346 }
 0x119   : > { %v375_v49 = vsub.f32 %v307_v15, %v347_v41  ;;  %v412_v62 = vmul.f32 1.442695, %v384_v59 }
 0x11b   : > { %v394_v52 = vmul.f32 1.442695, %v375_v49 }
 0x120   : > { %v349_v53 = vpop.xlane.xlu1 %348 }
 0x121   : > { %v376_v61 = vsub.f32 %v978_v17, %v349_v53 }
 0x123   : > { %v396_v63 = vmul.f32 1.442695, %v376_v61 }
 0x128   : > { %v351_v3 = vpop.xlane.xlu2 %350 }
 0x129   : > { %v377_v8 = vsub.f32 %v983_v19, %v351_v3  ;;  %v798_v19 = vld [vmem:[%s1141_s2 + $0x28] sm:$0xff] }
 0x12b   : > { %v398_v10 = vmul.f32 1.442695, %v377_v8 }
 0x12e   : > { %v371_v0 = vpop.xlane.xlu1 %370 }
 0x12f   : > { %v387_v9 = vsub.f32 %v986_v20, %v371_v0 }
 0x136   : > { %v353_v15 = vpop.xlane.xlu1 %352 }
 0x140   : > { %v357_v30 = vpop.xlane.xlu0 %356 }
 0x141   : > { %v380_v31 = vsub.f32 %v320_v23, %v357_v30  ;;  %v793_v30 = vld [vmem:[%s1141_s2] sm:$0xff] }
 0x143   : > { %v404_v33 = vmul.f32 1.442695, %v380_v31 }
 0x145   : > { %821 = vpow2.f32 %v404_v33 }
 0x148   : > { %v359_v34 = vpop.xlane.xlu0 %358 }
 0x149   : > { %v381_v35 = vsub.f32 %v322_v24, %v359_v34 }
 0x14b   : > { %v999_v36 = vpop.eup %821  ;;  %v406_v38 = vmul.f32 1.442695, %v381_v35 }
 0x14c   : > { %436 = vadd.xlane.f32.xlu2 %v999_v36 }
 0x14d   : > { %823 = vpow2.f32 %v406_v38 }
 0x14e   : > { %825 = vpow2.f32 %v388_v42 }
 0x14f   : > { %827 = vpow2.f32 %v408_v43 }
 0x150   : > { %v345_v44 = vpop.xlane.xlu0 %344 }
 0x151   : > { %v374_v45 = vsub.f32 %v305_v13, %v345_v44  ;;  %v418_v13 = vmul.f32 1.442695, %v387_v9 }
 0x153   : > { %v1002_v46 = vpop.eup %823  ;;  %v392_v48 = vmul.f32 1.442695, %v374_v45 }
 0x154   : > { %354 = vmax.xlane.f32.xlu2 %v992_v22  ;;  %438 = vadd.xlane.f32.xlu0 %v1002_v46  ;;  %v1006_v55 = vpop.eup %825 }
 0x155   : > { %829 = vpow2.f32 %v392_v48  ;;  %v1009_v57 = vpop.eup %827 }
 0x156   : > { %831 = vpow2.f32 %v410_v50 }
 0x157   : > { %833 = vpow2.f32 %v394_v52 }
 0x158   : > { %v367_v54 = vpop.xlane.xlu0 %366 }
 0x159   : > { %v385_v56 = vsub.f32 %v976_v16, %v367_v54  ;;  %v799_v16 = vld [vmem:[%s1141_s2 + $0x30] sm:$0xff] }
 0x15a   : > { %803 = vmatpush.bf16.msra.mxu2 %v799_v16  ;;  %561 = vmatpush.bf16.msra.mxu1 %v799_v16 }
 0x15b   : > { %v1011_v58 = vpop.eup %829  ;;  %v414_v60 = vmul.f32 1.442695, %v385_v56 }
 0x15c   : > { %440 = vadd.xlane.f32.xlu2 %v1009_v57  ;;  %420 = vadd.xlane.f32.xlu0 %v1006_v55  ;;  %v1018_v2 = vpop.eup %831 }
 0x15d   : > { %835 = vpow2.f32 %v414_v60  ;;  %424 = vadd.xlane.f32.xlu1 %v1011_v58  ;;  %v1021_v5 = vpop.eup %833 }
 0x15e   : > { %837 = vpow2.f32 %v412_v62  ;;  %804 = vmatpush.bf16.msra.mxu2 %v798_v19  ;;  %562 = vmatpush.bf16.msra.mxu1 %v798_v19 }
 0x15f   : > { %839 = vpow2.f32 %v396_v63 }
 0x160   : > { %v369_v1 = vpop.xlane.xlu0 %368 }
 0x161   : > { %v386_v4 = vsub.f32 %v981_v18, %v369_v1  ;;  %v378_v18 = vsub.f32 %v989_v21, %v353_v15 }
 0x162   : > { %805 = vmatpush.bf16.msra.mxu2 %v797_v25  ;;  %563 = vmatpush.bf16.msra.mxu1 %v797_v25 }
 0x163   : > { %v1023_v6 = vpop.eup %835  ;;  %v416_v7 = vmul.f32 1.442695, %v386_v4  ;;  %v400_v20 = vmul.f32 1.442695, %v378_v18 }
 0x164   : > { %426 = vadd.xlane.f32.xlu2 %v1021_v5  ;;  %442 = vadd.xlane.f32.xlu0 %v1018_v2  ;;  %v1033_v12 = vpop.eup %837 }
 0x165   : > { %841 = vpow2.f32 %v416_v7  ;;  %446 = vadd.xlane.f32.xlu1 %v1023_v6  ;;  %v1035_v14 = vpop.eup %839 }
 0x166   : > { %843 = vpow2.f32 %v398_v10  ;;  %806 = vmatpush.bf16.msra.mxu2 %v796_v26  ;;  %564 = vmatpush.bf16.msra.mxu1 %v796_v26 }
 0x167   : > { %845 = vpow2.f32 %v418_v13 }
 0x168   : > { %847 = vpow2.f32 %v400_v20 }
 0x16a   : > { %807 = vmatpush.bf16.msra.mxu2 %v795_v27  ;;  %565 = vmatpush.bf16.msra.mxu1 %v795_v27 }
 0x16b   : > { %v1040_v17 = vpop.eup %841 }
 0x16c   : > { %428 = vadd.xlane.f32.xlu2 %v1035_v14  ;;  %444 = vadd.xlane.f32.xlu0 %v1033_v12  ;;  %v1049_v23 = vpop.eup %843 }
 0x16d   : > { %448 = vadd.xlane.f32.xlu1 %v1040_v17  ;;  %v1051_v24 = vpop.eup %845 }
 0x16e   : > { %v1055_v21 = vpop.eup %847  ;;  %808 = vmatpush.bf16.msra.mxu2 %v794_v28  ;;  %566 = vmatpush.bf16.msra.mxu1 %v794_v28 }
 0x172   : > { %809 = vmatpush.bf16.msra.mxu2 %v793_v30  ;;  %567 = vmatpush.bf16.msra.mxu1 %v793_v30 }
 0x174   : > { %450 = vadd.xlane.f32.xlu2 %v1051_v24  ;;  %430 = vadd.xlane.f32.xlu0 %v1049_v23 }
 0x17c   : > { %432 = vadd.xlane.f32.xlu0 %v1055_v21 }
 0x187   : > { %v423_v38 = vpop.xlane.xlu1 %422 }
 0x1bf   : > { %v437_v31 = vpop.xlane.xlu2 %436 }
 0x1c0   : > { %849 = vrcp.f32 %v437_v31 }
 0x1c6   : > { %v850_v37 = vpop.eup %849 }
 0x1c7   : > { %v355_v32 = vpop.xlane.xlu2 %354  ;;  %v439_v33 = vpop.xlane.xlu0 %438  ;;  %v476_v41 = vmul.f32 %v850_v37, %v999_v36 }
 0x1c8   : > { %v379_v34 = vsub.f32 %v992_v22, %v355_v32  ;;  %851 = vrcp.f32 %v439_v33 }
 0x1ca   : > { %v402_v35 = vmul.f32 1.442695, %v379_v34 }
 0x1cc   : > { %853 = vpow2.f32 %v402_v35 }
 0x1cd   : > { %855 = vrcp.f32 %v423_v38 }
 0x1ce   : > { %v852_v39 = vpop.eup %851 }
 0x1cf   : > { %v421_v40 = vpop.xlane.xlu0 %420  ;;  %v477_v42 = vmul.f32 %v852_v39, %v1002_v46  ;;  %v441_v43 = vpop.xlane.xlu2 %440 }
 0x1d0   : > { %857 = vrcp.f32 %v421_v40  ;;  %v425_v36 = vpop.xlane.xlu1 %424 }
 0x1d1   : > { %v488_v44 = vpack.c.bf16 %v477_v42, %v476_v41  ;;  %859 = vrcp.f32 %v441_v43 }
 0x1d2   : > { %v1076_v45 = vpop.eup %853 }
 0x1d3   : > { %434 = vadd.xlane.f32.xlu1 %v1076_v45  ;;  %588 = vmatmul.bf16.vlgmr.msra.gmra.mxu2 %v488_v44  ;;  %v856_v22 = vpop.eup %855 }
 0x1d4   : > { %v469_v50 = vmul.f32 %v856_v22, %v996_v29 }
 0x1d6   : > { %v858_v48 = vpop.eup %857 }
 0x1d7   : > { %v443_v47 = vpop.xlane.xlu0 %442  ;;  %v468_v49 = vmul.f32 %v858_v48, %v1006_v55  ;;  %v427_v46 = vpop.xlane.xlu2 %426 }
 0x1d8   : > { %861 = vrcp.f32 %v443_v47  ;;  %v860_v52 = vpop.eup %859  ;;  %v447_v62 = vpop.xlane.xlu1 %446 }
 0x1d9   : > { %v484_v51 = vpack.c.bf16 %v469_v50, %v468_v49  ;;  %863 = vrcp.f32 %v427_v46  ;;  %v478_v56 = vmul.f32 %v860_v52, %v1009_v57 }
 0x1da   : > { %865 = vrcp.f32 %v425_v36 }
 0x1db   : > { %568 = vmatmul.bf16.vlgmr.msra.gmra.mxu1 %v484_v51 }
 0x1de   : > { %v862_v53 = vpop.eup %861 }
 0x1df   : > { %v445_v54 = vpop.xlane.xlu0 %444  ;;  %v479_v59 = vmul.f32 %v862_v53, %v1018_v2  ;;  %v864_v61 = vpop.eup %863 }
 0x1e0   : > { %v866_v55 = vpop.eup %865  ;;  %867 = vrcp.f32 %v445_v54  ;;  %v471_v29 = vmul.f32 %v864_v61, %v1021_v5  ;;  %v429_v63 = vpop.xlane.xlu2 %428 }
 0x1e1   : > { %v489_v60 = vpack.c.bf16 %v479_v59, %v478_v56  ;;  %869 = vrcp.f32 %v447_v62  ;;  %v470_v0 = vmul.f32 %v866_v55, %v1011_v58  ;;  %v449_v11 = vpop.xlane.xlu1 %448 }
 0x1e3   : > { %593 = vmatmul.bf16.gmra.mxu2 %v489_v60  ;;  %v485_v3 = vpack.c.bf16 %v471_v29, %v470_v0 }
 0x1e6   : > { %v868_v4 = vpop.eup %867 }
 0x1e7   : > { %v431_v1 = vpop.xlane.xlu0 %430  ;;  %v870_v7 = vpop.eup %869  ;;  %v480_v57 = vmul.f32 %v868_v4, %v1033_v12 }
 0x1e8   : > { %871 = vrcp.f32 %v431_v1  ;;  %v481_v2 = vmul.f32 %v870_v7, %v1023_v6  ;;  %v451_v8 = vpop.xlane.xlu2 %450 }
 0x1e9   : > { %873 = vrcp.f32 %v429_v63 }
 0x1ea   : > { %v490_v9 = vpack.c.bf16 %v481_v2, %v480_v57  ;;  %875 = vrcp.f32 %v451_v8 }
 0x1eb   : > { %573 = vmatmul.bf16.gmra.mxu1 %v485_v3  ;;  %877 = vrcp.f32 %v449_v11 }
 0x1ee   : > { %v872_v10 = vpop.eup %871 }
 0x1ef   : > { %v874_v5 = vpop.eup %873  ;;  %v473_v58 = vmul.f32 %v872_v10, %v1049_v23  ;;  %v433_v20 = vpop.xlane.xlu0 %432 }
 0x1f0   : > { %v472_v13 = vmul.f32 %v874_v5, %v1035_v14  ;;  %v876_v16 = vpop.eup %875  ;;  %879 = vrcp.f32 %v433_v20 }
 0x1f1   : > { %v878_v18 = vpop.eup %877  ;;  %v483_v12 = vmul.f32 %v876_v16, %v1051_v24  ;;  %v1096_v24 = vld [vmem:[%s1142_s3] ss:$0 sm:$0xff] }
 0x1f2   : > { %v486_v15 = vpack.c.bf16 %v473_v58, %v472_v13  ;;  %v482_v6 = vmul.f32 %v878_v18, %v1040_v17 }
 0x1f3   : > { %598 = vmatmul.bf16.gmra.mxu2 %v490_v9 }
 0x1f4   : > { %v491_v19 = vpack.c.bf16 %v483_v12, %v482_v6 }
 0x1f6   : > { %v880_v26 = vpop.eup %879 }
 0x1f7   : > { %v474_v27 = vmul.f32 %v880_v26, %v1055_v21 }
 0x1fb   : > { %578 = vmatmul.bf16.gmra.mxu1 %v486_v15 }
 0x203   : > { %603 = vmatmul.bf16.gmra.mxu2 %v491_v19 }
 0x246   : > { %v435_v25 = vpop.xlane.xlu1 %434 }
 0x247   : > { %881 = vrcp.f32 %v435_v25 }
 0x24d   : > { %v882_v23 = vpop.eup %881 }
 0x24e   : > { %v475_v14 = vmul.f32 %v882_v23, %v1076_v45 }
 0x250   : > { %v487_v28 = vpack.c.bf16 %v475_v14, %v474_v27 }
 0x252   : > { %583 = vmatmul.bf16.gmra.mxu1 %v487_v28 }
 0x256   : > { %v589_v17 = vpop.f32.mrf.mxu2 }
 0x257   : > { %v590_v30 = vadd.f32 %v1096_v24, %v589_v17 }
 0x258   : > { %v569_v31 = vpop.f32.mrf.mxu1 }
 0x259   : > { %883 = vtanh.f32 %v590_v30  ;;  %v570_v32 = vadd.f32 %v1096_v24, %v569_v31 }
 0x25b   : > { %885 = vtanh.f32 %v570_v32 }
 0x25e   : > { %v591_v21 = vpop.f32.mrf.mxu2 }
 0x25f   : > { %v884_v33 = vpop.eup %883  ;;  %v592_v34 = vadd.f32 %v1096_v24, %v591_v21 }
 0x260   : > { %633 = vst [vmem:[%s1104_s21 + $0x40] sm:$0xff] %v884_v33  ;;  %v571_v35 = vpop.f32.mrf.mxu1 }
 0x261   : > { %887 = vtanh.f32 %v592_v34  ;;  %v886_v37 = vpop.eup %885  ;;  %v572_v38 = vadd.f32 %v1096_v24, %v571_v35 }
 0x262   : > { %625 = vst [vmem:[%s1104_s21] sm:$0xff] %v886_v37 }
 0x263   : > { %889 = vtanh.f32 %v572_v38 }
 0x266   : > { %v594_v40 = vpop.f32.mrf.mxu2 }
 0x267   : > { %v888_v39 = vpop.eup %887  ;;  %v595_v41 = vadd.f32 %v1096_v24, %v594_v40 }
 0x268   : > { %634 = vst [vmem:[%s1104_s21 + $0x48] sm:$0xff] %v888_v39  ;;  %v574_v42 = vpop.f32.mrf.mxu1 }
 0x269   : > { %v890_v43 = vpop.eup %889  ;;  %891 = vtanh.f32 %v595_v41  ;;  %v575_v44 = vadd.f32 %v1096_v24, %v574_v42 }
 0x26a   : > { %626 = vst [vmem:[%s1104_s21 + $0x8] sm:$0xff] %v890_v43 }
 0x26b   : > { %893 = vtanh.f32 %v575_v44 }
 0x26e   : > { %v596_v45 = vpop.f32.mrf.mxu2 }
 0x26f   : > { %v892_v22 = vpop.eup %891  ;;  %v597_v47 = vadd.f32 %v1096_v24, %v596_v45 }
 0x270   : > { %635 = vst [vmem:[%s1104_s21 + $0x50] sm:$0xff] %v892_v22  ;;  %v576_v48 = vpop.f32.mrf.mxu1 }
 0x271   : > { %v894_v49 = vpop.eup %893  ;;  %895 = vtanh.f32 %v597_v47  ;;  %v577_v50 = vadd.f32 %v1096_v24, %v576_v48 }
 0x272   : > { %627 = vst [vmem:[%s1104_s21 + $0x10] sm:$0xff] %v894_v49 }
 0x273   : > { %897 = vtanh.f32 %v577_v50 }
 0x276   : > { %v599_v36 = vpop.f32.mrf.mxu2 }
 0x277   : > { %v896_v46 = vpop.eup %895  ;;  %v600_v51 = vadd.f32 %v1096_v24, %v599_v36 }
 0x278   : > { %636 = vst [vmem:[%s1104_s21 + $0x58] sm:$0xff] %v896_v46  ;;  %v579_v52 = vpop.f32.mrf.mxu1 }
 0x279   : > { %v898_v53 = vpop.eup %897  ;;  %899 = vtanh.f32 %v600_v51  ;;  %v580_v54 = vadd.f32 %v1096_v24, %v579_v52 }
 0x27a   : > { %628 = vst [vmem:[%s1104_s21 + $0x18] sm:$0xff] %v898_v53 }
 0x27b   : > { %901 = vtanh.f32 %v580_v54 }
 0x27e   : > { %v601_v56 = vpop.f32.mrf.mxu2 }
 0x27f   : > { %v900_v59 = vpop.eup %899  ;;  %v602_v60 = vadd.f32 %v1096_v24, %v601_v56 }
 0x280   : > { %637 = vst [vmem:[%s1104_s21 + $0x60] sm:$0xff] %v900_v59  ;;  %v581_v61 = vpop.f32.mrf.mxu1 }
 0x281   : > { %v902_v62 = vpop.eup %901  ;;  %903 = vtanh.f32 %v602_v60  ;;  %v582_v55 = vadd.f32 %v1096_v24, %v581_v61 }
 0x282   : > { %629 = vst [vmem:[%s1104_s21 + $0x20] sm:$0xff] %v902_v62 }
 0x283   : > { %905 = vtanh.f32 %v582_v55 }
 0x286   : > { %v604_v29 = vpop.f32.mrf.mxu2 }
 0x287   : > { %v904_v63 = vpop.eup %903  ;;  %v605_v0 = vadd.f32 %v1096_v24, %v604_v29 }
 0x288   : > { %638 = vst [vmem:[%s1104_s21 + $0x68] sm:$0xff] %v904_v63 }
 0x289   : > { %v906_v1 = vpop.eup %905  ;;  %907 = vtanh.f32 %v605_v0 }
 0x28a   : > { %630 = vst [vmem:[%s1104_s21 + $0x28] sm:$0xff] %v906_v1 }
 0x28e   : > { %v606_v3 = vpop.f32.mrf.mxu2 }
 0x28f   : > { %v908_v4 = vpop.eup %907  ;;  %v607_v7 = vadd.f32 %v1096_v24, %v606_v3 }
 0x290   : > { %639 = vst [vmem:[%s1104_s21 + $0x70] sm:$0xff] %v908_v4 }
 0x291   : > { %909 = vtanh.f32 %v607_v7 }
 0x297   : > { %v910_v57 = vpop.eup %909 }
 0x298   : > { %640 = vst [vmem:[%s1104_s21 + $0x78] sm:$0xff] %v910_v57 }
 0x2cf   : > { %v584_v2 = vpop.f32.mrf.mxu1 }
 0x2d0   : > { %v585_v8 = vadd.f32 %v1096_v24, %v584_v2 }
 0x2d2   : > { %911 = vtanh.f32 %v585_v8 }
 0x2d7   : > { %v586_v9 = vpop.f32.mrf.mxu1 }
 0x2d8   : > { %v912_v10 = vpop.eup %911  ;;  %v587_v11 = vadd.f32 %v1096_v24, %v586_v9 }
 0x2d9   : > { %631 = vst [vmem:[%s1104_s21 + $0x30] sm:$0xff] %v912_v10 }
 0x2da   : > { %913 = vtanh.f32 %v587_v11 }
 0x2e0   : > { %v914_v5 = vpop.eup %913 }
 0x2e1   : > { %632 = vst [vmem:[%s1104_s21 + $0x38] sm:$0xff] %v914_v5 }
 0x2e2 PF: > { %s14_s15 = sadd.s32 1, %s921_s15  }
 0x2e3   : > { %p11_p4 = scmp.ge.s32.totalorder %s14_s15, 4  }
 0x2e5   :  { %13 = sbr.rel (!%p11_p4) target bundleno = 1 (0x1), region = 66 }

</bundles_post_ra>
